<compile_context>
chip_gen: v7x
topology: tpu7x:2x2x1
jax: 0.10.0
libtpu: 0.0.40
codegen_flags: <defaults>
</compile_context>

<pallas_src>
from math import ceil

import jax
import jax.numpy as jnp
from jax.experimental import pallas as pl
from jax.experimental.pallas import tpu as pltpu

OUTPUT_SIZE = 724  # dipy.data.get_sphere('symmetric724').vertices.shape[0]


def _mlp2_kernel(x_ref, w1_ref, b1_ref, w2_ref, b2_ref, o_ref):
    # Layer 1: Linear + ReLU (dropout is identity: dropout=None / eval mode)
    h = jnp.dot(x_ref[...], w1_ref[...], preferred_element_type=jnp.float32)
    h = jnp.maximum(h + b1_ref[...], 0.0)
    # TODO(synk): dropout with p>0 in training mode would need pltpu.prng_*
    # masking; the reference module defaults to dropout=None (identity).
    # Layer 2: Linear (no activation) -> logits.  Cast h to the weight dtype so
    # the (dominant) second matmul runs on the MXU in bf16 when mxu_bf16=True.
    out = jnp.dot(h.astype(w2_ref.dtype), w2_ref[...],
                  preferred_element_type=jnp.float32)
    o_ref[...] = (out + b2_ref[...]).astype(o_ref.dtype)


def _round_up(x, m):
    return ((x + m - 1) // m) * m


def sphere_classification_forward(x, w1, b1, w2, b2, *, tile_m=2048,
                                  mxu_bf16=False):
    """Fused 2-layer MLP forward.

    x: [N, D] float32, w1: [D, H], b1: [1, H], w2: [H, 724], b2: [1, 724].
    Returns logits [N, 724] float32. Handles arbitrary N (ragged last tile,
    no wrapper-side padding or slicing of the output).
    """
    n, d = x.shape
    hidden = w1.shape[1]
    out_size = w2.shape[1]  # 724

    if mxu_bf16:
        # bf16 MXU inputs, f32 accumulation + f32 bias/output (accuracy kept).
        x = x.astype(jnp.bfloat16)
        w1 = w1.astype(jnp.bfloat16)
        w2 = w2.astype(jnp.bfloat16)
    in_bytes = jnp.dtype(x.dtype).itemsize
    w_bytes = jnp.dtype(w1.dtype).itemsize

    # --- Batch tile: multiple of 8, <= 4096, and small enough that the grid
    # --- has >= 2 parallel steps whenever n > 8 (v7x has 2 TensorCores). ------
    tile_m_req = min(max(8, (int(tile_m) // 8) * 8), 4096)
    tile_m_eff = max(8, min(tile_m_req, _round_up(pl.cdiv(n, 2), 8)))
    grid = (pl.cdiv(n, tile_m_eff),)  # ragged last tile handled by Pallas

    # --- VMEM budget: double-buffered x + out tiles, resident weights ---------
    tiles_bytes = 2 * tile_m_eff * (d * in_bytes + out_size * 4)
    weights_bytes = 2 * ((d * hidden + hidden * out_size) * w_bytes
                         + (hidden + out_size) * 4)
    vmem_bytes = int((tiles_bytes + weights_bytes) * 1.3) + (2 << 20)
    # Floor at the v5e default (16 MiB); ceiling 36 MiB leaves headroom inside
    # v7x's 64 MiB physical VMEM while still allowing 4k-row tiles.
    vmem_bytes = min(max(vmem_bytes, 16 << 20), 36 << 20)

    cost = pl.CostEstimate(
        flops=2 * n * (d * hidden + hidden * out_size),
        transcendentals=0,
        bytes_accessed=(n * d * in_bytes + n * out_size * 4
                        + (d * hidden + hidden * out_size) * w_bytes
                        + (hidden + out_size) * 4),
    )

    logits = pl.pallas_call(
        _mlp2_kernel,
        out_shape=jax.ShapeDtypeStruct((n, out_size), jnp.float32),
        grid_spec=pl.GridSpec(
            grid=grid,
            in_specs=[
                pl.BlockSpec((tile_m_eff, d), lambda i: (i, 0)),      # x tile
                pl.BlockSpec((d, hidden), lambda i: (0, 0)),          # W1 (resident)
                pl.BlockSpec((1, hidden), lambda i: (0, 0)),          # b1
                pl.BlockSpec((hidden, out_size), lambda i: (0, 0)),   # W2 (resident)
                pl.BlockSpec((1, out_size), lambda i: (0, 0)),        # b2
            ],
            out_specs=pl.BlockSpec((tile_m_eff, out_size), lambda i: (i, 0)),
        ),
        compiler_params=pltpu.CompilerParams(
            dimension_semantics=("parallel",),
            vmem_limit_bytes=vmem_bytes,
        ),
        cost_estimate=cost,
    )(x, w1, b1, w2, b2)

    return logits


def init_params(key, input_size):
    """Deterministic init mimicking torch.nn.Linear: U(-1/sqrt(fan_in), 1/sqrt(fan_in))."""
    hidden_size = ceil(input_size / 2)
    k1, k2, k3, k4 = jax.random.split(key, 4)

    bound1 = 1.0 / jnp.sqrt(jnp.float32(input_size))
    w1 = jax.random.uniform(k1, (input_size, hidden_size), jnp.float32,
                            minval=-bound1, maxval=bound1)
    b1 = jax.random.uniform(k2, (1, hidden_size), jnp.float32,
                            minval=-bound1, maxval=bound1)

    bound2 = 1.0 / jnp.sqrt(jnp.float32(hidden_size))
    w2 = jax.random.uniform(k3, (hidden_size, OUTPUT_SIZE), jnp.float32,
                            minval=-bound2, maxval=bound2)
    b2 = jax.random.uniform(k4, (1, OUTPUT_SIZE), jnp.float32,
                            minval=-bound2, maxval=bound2)
    return w1, b1, w2, b2


def reference_forward(x, w1, b1, w2, b2):
    h = jnp.maximum(x @ w1 + b1, 0.0)
    return h @ w2 + b2


if __name__ == "__main__":
    key = jax.random.PRNGKey(0)
    k_x, k_p, k_x2 = jax.random.split(key, 3)

    input_size = 32    # per-point input feature size
    w1, b1, w2, b2 = init_params(k_p, input_size)

    # Small batch, not a multiple of 8 -> single ragged tile / 2-step grid.
    batch = 10
    x = jax.random.normal(k_x, (batch, input_size), jnp.float32)
    logits = jax.block_until_ready(
        sphere_classification_forward(x, w1, b1, w2, b2))
    ref = reference_forward(x, w1, b1, w2, b2)
    assert logits.shape == (batch, OUTPUT_SIZE)
    assert jnp.allclose(logits, ref, atol=1e-4, rtol=1e-4)

    # Larger batch (not a multiple of the tile) -> multi-tile grid with a
    # partial last tile; exercises the cdiv-grid / masked-writeback path.
    batch2 = 300
    x2 = jax.random.normal(k_x2, (batch2, input_size), jnp.float32)
    logits2 = jax.block_until_ready(
        sphere_classification_forward(x2, w1, b1, w2, b2))
    ref2 = reference_forward(x2, w1, b1, w2, b2)
    assert logits2.shape == (batch2, OUTPUT_SIZE)
    assert jnp.allclose(logits2, ref2, atol=1e-4, rtol=1e-4)

    # bf16-MXU path (f32 accumulate): loose tolerance vs the f32 reference.
    logits_bf16 = jax.block_until_ready(
        sphere_classification_forward(x2, w1, b1, w2, b2, mxu_bf16=True))
    assert jnp.allclose(logits_bf16, ref2, atol=5e-2, rtol=5e-2)

    print("KERNEL_OK")
</pallas_src>

<mosaic_0001>
module attributes {stable_mosaic.version = 11 : i64} {
  func.func @_mlp2_kernel(%arg0: i32, %arg1: memref<8x32xf32, #tpu.memory_space<vmem>>, %arg2: memref<32x16xf32, #tpu.memory_space<vmem>>, %arg3: memref<1x16xf32, #tpu.memory_space<vmem>>, %arg4: memref<16x724xf32, #tpu.memory_space<vmem>>, %arg5: memref<1x724xf32, #tpu.memory_space<vmem>>, %arg6: memref<8x724xf32, #tpu.memory_space<vmem>>) attributes {dimension_semantics = [#tpu.dimension_semantics<parallel>], iteration_bounds = array<i64: 2>, scalar_prefetch = 0 : i64, scratch_operands = 0 : i64, tpu.core_type = #tpu.core_type<tc>, window_params = [{transform_indices = @transform_0, window_bounds = array<i64: 8, 32>}, {pipeline_mode = #tpu.pipeline_mode<synchronous>, transform_indices = @transform_1, window_bounds = array<i64: 32, 16>}, {pipeline_mode = #tpu.pipeline_mode<synchronous>, transform_indices = @transform_2, window_bounds = array<i64: 1, 16>}, {pipeline_mode = #tpu.pipeline_mode<synchronous>, transform_indices = @transform_3, window_bounds = array<i64: 16, 724>}, {pipeline_mode = #tpu.pipeline_mode<synchronous>, transform_indices = @transform_4, window_bounds = array<i64: 1, 724>}, {transform_indices = @transform_5, window_bounds = array<i64: 8, 724>}]} {
    %c0 = arith.constant 0 : index
    %c0_0 = arith.constant 0 : index
    %0 = vector.load %arg1[%c0, %c0_0] : memref<8x32xf32, #tpu.memory_space<vmem>>, vector<8x32xf32>
    %c0_1 = arith.constant 0 : index
    %c0_2 = arith.constant 0 : index
    %1 = vector.load %arg2[%c0_1, %c0_2] : memref<32x16xf32, #tpu.memory_space<vmem>>, vector<32x16xf32>
    %cst = arith.constant dense<0.000000e+00> : vector<8x16xf32>
    %2 = tpu.matmul %0, %1, %cst {dimension_numbers = #tpu.dot_dimension_numbers<[1], [0], [0], [1], [0, 0, 1, 1], [], []>} : vector<8x32xf32>, vector<32x16xf32>, vector<8x16xf32> -> vector<8x16xf32>
    %c0_3 = arith.constant 0 : index
    %c0_4 = arith.constant 0 : index
    %3 = vector.load %arg3[%c0_3, %c0_4] : memref<1x16xf32, #tpu.memory_space<vmem>>, vector<1x16xf32>
    %4 = vector.broadcast %3 : vector<1x16xf32> to vector<8x16xf32>
    %5 = arith.addf %2, %4 : vector<8x16xf32>
    %cst_5 = arith.constant 0.000000e+00 : f32
    %6 = vector.broadcast %cst_5 : f32 to vector<8x16xf32>
    %7 = arith.maximumf %5, %6 : vector<8x16xf32>
    %c0_6 = arith.constant 0 : index
    %c0_7 = arith.constant 0 : index
    %8 = vector.load %arg4[%c0_6, %c0_7] : memref<16x724xf32, #tpu.memory_space<vmem>>, vector<16x724xf32>
    %cst_8 = arith.constant dense<0.000000e+00> : vector<8x724xf32>
    %9 = tpu.matmul %7, %8, %cst_8 {dimension_numbers = #tpu.dot_dimension_numbers<[1], [0], [0], [1], [0, 0, 1, 1], [], []>} : vector<8x16xf32>, vector<16x724xf32>, vector<8x724xf32> -> vector<8x724xf32>
    %c0_9 = arith.constant 0 : index
    %c0_10 = arith.constant 0 : index
    %10 = vector.load %arg5[%c0_9, %c0_10] : memref<1x724xf32, #tpu.memory_space<vmem>>, vector<1x724xf32>
    %11 = vector.broadcast %10 : vector<1x724xf32> to vector<8x724xf32>
    %12 = arith.addf %9, %11 : vector<8x724xf32>
    %c0_11 = arith.constant 0 : index
    %c0_12 = arith.constant 0 : index
    %13 = vector.load %arg6[%c0_11, %c0_12] : memref<8x724xf32, #tpu.memory_space<vmem>>, vector<8x724xf32>
    tpu.vector_store %arg6[%c0_11, %c0_12], %12 {strides = array<i32>} : memref<8x724xf32, #tpu.memory_space<vmem>>, vector<8x724xf32>,
    return
  }
  func.func @transform_0(%arg0: i32) -> (i32, i32) {
    %c0_i32 = arith.constant 0 : i32
    %c0_i32_0 = arith.constant 0 : i32
    return %arg0, %c0_i32 : i32, i32
  }
  func.func @transform_1(%arg0: i32) -> (i32, i32) {
    %c0_i32 = arith.constant 0 : i32
    %c0_i32_0 = arith.constant 0 : i32
    %c0_i32_1 = arith.constant 0 : i32
    return %c0_i32, %c0_i32_0 : i32, i32
  }
  func.func @transform_2(%arg0: i32) -> (i32, i32) {
    %c0_i32 = arith.constant 0 : i32
    %c0_i32_0 = arith.constant 0 : i32
    %c0_i32_1 = arith.constant 0 : i32
    return %c0_i32, %c0_i32_0 : i32, i32
  }
  func.func @transform_3(%arg0: i32) -> (i32, i32) {
    %c0_i32 = arith.constant 0 : i32
    %c0_i32_0 = arith.constant 0 : i32
    %c0_i32_1 = arith.constant 0 : i32
    return %c0_i32, %c0_i32_0 : i32, i32
  }
  func.func @transform_4(%arg0: i32) -> (i32, i32) {
    %c0_i32 = arith.constant 0 : i32
    %c0_i32_0 = arith.constant 0 : i32
    %c0_i32_1 = arith.constant 0 : i32
    return %c0_i32, %c0_i32_0 : i32, i32
  }
  func.func @transform_5(%arg0: i32) -> (i32, i32) {
    %c0_i32 = arith.constant 0 : i32
    %c0_i32_0 = arith.constant 0 : i32
    return %arg0, %c0_i32 : i32, i32
  }
}

</mosaic_0001>

<bundles_post_ra>
// kernel: tpu_custom_call.1
= control target key start
LH: loop header
LB: loop body
LE: loop exit
PB: predicated region body
PF: predicated region fallthrough
CT: control target
= control target key end

     0   :  { %10 = vsyncpa [#allocation3], 0  ;;  %s1072_s0 = inlined_call_operand.vmem [shape: f32[10,32], index: 0, kind: input, shape index: {}]   ;;  %s1073_s1 = inlined_call_operand.vmem [shape: f32[32,16], index: 1, kind: input, shape index: {}]   ;;  %s1074_s2 = inlined_call_operand.vmem [shape: f32[1,16], index: 2, kind: input, shape index: {}]   ;;  %s1075_s3 = inlined_call_operand.hbm [shape: f32[16,724], index: 3, kind: input, shape index: {}]   ;;  %s1076_s4 = inlined_call_operand.vmem [shape: f32[1,724], index: 4, kind: input, shape index: {}]   ;;  %s1077_s5 = inlined_call_operand.hbm [shape: f32[10,724], index: 5, kind: output, shape index: {}]  }
   0x1   :  { %11 = vsyncpa [#allocation4], 0 }
   0x2   :  { %13 = vsyncpa [#allocation4 + $0x1], 0  ;;  %s915_s18 = smov 0   ;;  %s917_s19 = smov 0  }
   0x3   :  { %s919_s20 = smov 0   ;;  %s921_s21 = smov 0  }
   0x4 LB: > { %s936_s22 = sadd.s32 4294967295, %s876_s21   ;;  %s676_s23 = sadd.s32 4294967294, %s876_s21   ;;  %s876_s21 = sphi %s921_s21, %s1093_s21   ;;  %s872_s20 = sphi %s919_s20, %s1092_s20   ;;  %s868_s19 = sphi %s917_s19, %s1091_s19   ;;  %s864_s18 = sphi %s915_s18, %s1090_s18  }
   0x5   : > { %s940_s24 = sadd.s32 1, %s876_s21   ;;  %s136_s25 = sadd.s32 1, %s872_s20 }
   0x6   : > { %s133_s26 = ssub.s32 %s876_s21, %s940_s24  ;;  %p146_p0 = scmp.ne.s32.totalorder %s872_s20, %s868_s19 }
   0x7   : > { %p134_p1 = scmp.eq.s32.totalorder %s133_s26, 0  ;;  %p147_p2 = scmp.eq.s32.totalorder %s936_s22, 1 }
   0x8   : > { %p152_p3 = scmp.ne.s32.totalorder %s868_s19, %s864_s18  ;;  %p153_p4 = scmp.eq.s32.totalorder %s676_s23, 1 }
   0x9   : > { %s951_s27 = scalar_select %p134_p1, %s872_s20, %s136_s25  }
   0xa   : > { %p953_p5 = por %p147_p2, %p146_p0  ;;  %p957_p6 = por %p153_p4, %p152_p3 }
   0xb   : > { %p677_p7 = scmp.ge.s32.totalorder %s876_s21, 1  ;;  %p160_p8 = scmp.lt.s32.totalorder %s876_s21, 3 }
   0xc   : > { %s1081_s28 = scalar_select %p953_p5, 1, 0 }
   0xd   : > { %s1082_s29 = scalar_select %p957_p6, 1, 0 }
   0xe   : > { %p1078_p9 = scmp.eq.s32.totalorder %s936_s22, 0  ;;  %p964_p10 = pnand %p677_p7, %p160_p8 }
   0xf   : > { %s878_s6 = smov [#allocation2]   ;;  %s782_s11 = scalar_lea.hbm %s1075_s3, 1536 }
  0x10   : > { %s1083_s30 = scalar_select %p964_p10, 1, 0 }
  0x11   : > { %s178_s7 = sshll.u32 %s878_s6, 4  ;;  %p733_p11 = pneg %p964_p10  ;;  %s179_s7 = int_to_ptr.vmem [resolvable:$true] %s178_s7 }
  0x12   : > { %p783_p13 = scmp.ne.s32.totalorder %s1075_s3, %s782_s11  ;;  %p789_p3 = scmp.lt.u32.totalorder %s782_s11, %s1075_s3 }
  0x13   : > { %p972_p12 = pnand %p1078_p9, %p733_p11 }
  0x15   : > { %p784_p0 = pneg %p972_p12 }
  0x17   : > { %p785_p1 = pnand %p784_p0, %p783_p13 }
  0x19   : > { %p786_p2 = pneg %p785_p1 }
  0x1b   : > { %p791_p4 = pnand %p789_p3, %p786_p2 }
  0x1d   : > { %794 = shalt.err (!%p791_p4)
}
  0x1e   : > { %s795_s16 = scalar_lea.vmem %s179_s7, 1536  ;;  %p803_p9 = scmp.lt.s32.totalorder %s179_s7, %s179_s7 }
  0x1f   : > { %p796_p7 = scmp.ne.s32.totalorder %s179_s7, %s795_s16  ;;  %p804_p6 = scmp.lt.s32.totalorder %s795_s16, %s795_s16 }
  0x21   : > { %p798_p8 = pnand %p796_p7, %p784_p0  ;;  %p805_p5 = por %p804_p6, %p803_p9 }
  0x23   : > { %p799_p11 = pneg %p798_p8 }
  0x25   : > { %p806_p10 = pnand %p805_p5, %p799_p11 }
  0x27   : > { %809 = shalt.err (!%p806_p10)
}
  0x28   : > { %s879_s17 = smov 768   ;;  %s880_s23 = smov 48  }
  0x29   : > { %736 = dma.hbm_to_vmem [thread:$0]  (!%p972_p12), %s1075_s3, 1536, %s179_s7, [#allocation3], %s879_s17, %s879_s17, %s880_s23  }
  0x2a   : > { %p1085_p13 = scmp.ne.s32.totalorder %s1083_s30, 0 }
  0x2b   : > { %p1086_p1 = scmp.eq.s32.totalorder (!%p1085_p13), %s936_s22, 0 }
  0x2c   : > { %204 = sbr.rel (%p1085_p13) target bundleno = 511 (0x1ff), region = 40 }
  0x33   : > { %855 = dma.done.wait (%p1086_p1), [#allocation3], 1536   ;;  %p1087_p0 = pmov %p1086_p1 }
  0x34   : > { %p231_p5 = scmp.lt.s32.totalorder %s936_s22, 1  ;;  %v881_v0 = vmov 0.0|0.0   ;;  %vm882_vm0 = vmmov 0   ;;  %v883_v1 = vmov 0.0   ;;  %v236_v2 = vld [vmem:[%s1073_s1] sm:$0xff]  ;;  %v237_v3 = vld [vmem:[%s1073_s1 + $0x8] sm:$0xff]  ;;  %v336_v32 = vlaneseq }
  0x35   : > { %857 = vsyncadd (%p1087_p0), [#allocation3], 4294965760  ;;  %707 = vmatprep.subr.bf16.mxu0 %v881_v0  ;;  %704 = vmatprep.mubr.msk.f32.mxu0 %vm882_vm0, %v883_v1  ;;  %v238_v4 = vld [vmem:[%s1073_s1 + $0x10] sm:$0xff]  ;;  %v708_v5 = vpack.c.bf16 %v237_v3, %v236_v2  ;;  %v239_v6 = vld [vmem:[%s1073_s1 + $0x18] sm:$0xff]  ;;  %vm247_vm1 = vcmask 261120   ;;  %vm366_vm2 = vcmask 130048  }
  0x36   : > { %434 = vmatprep.mubr.f32.mxu1 %v883_v1  ;;  %s232_s6 = scalar_select %p231_p5, %s936_s22, 1  ;;  %v711_v7 = vpack.c.bf16 %v239_v6, %v238_v4  ;;  %v323_v9 = vld [vmem:[#allocation2 + $0x8] sm:$0xff]  ;;  %v329_v10 = vld [vmem:[#allocation2 + $0x38] sm:$0xff]  ;;  %v322_v13 = vld [vmem:[#allocation2] sm:$0xff]  ;;  %v337_v33 = vshrl.u32 %v336_v32, 7  ;;  %vm588_vm3 = vcmask 687104  }
  0x37   : > { %709 = vmatpush3.bf16.msra.mxu0 %v708_v5  ;;  %v327_v11 = vld [vmem:[#allocation2 + $0x28] sm:$0xff]  ;;  %v713_v12 = vpack.c.bf16 %v329_v10, %v323_v9  ;;  %v328_v14 = vld [vmem:[#allocation2 + $0x30] sm:$0xff]  ;;  %v333_v15 = vld [vmem:[#allocation2 + $0x58] sm:$0xff]  ;;  %s228_s26 = sand.u32 1, %s868_s19   ;;  %s726_s30 = smul.u32 768, %s936_s22 }
  0x38   : > { %s682_s14 = sshll.u32 %s232_s6, 3  ;;  %710 = vmatprep.subr.bf16.mxu0 %v881_v0  ;;  %v715_v16 = vpack.c.bf16 %v328_v14, %v322_v13  ;;  %v721_v17 = vpack.c.bf16 %v333_v15, %v327_v11  ;;  %v326_v18 = vld [vmem:[#allocation2 + $0x20] sm:$0xff]  ;;  %v332_v19 = vld [vmem:[#allocation2 + $0x50] sm:$0xff]  ;;  %v325_v21 = vld [vmem:[#allocation2 + $0x18] sm:$0xff]  ;;  %v338_v34 = vsub.s32 0, %v337_v33  ;;  %v354_v35 = vsub.s32 4, %v337_v33 }
  0x39   : > { %s234_s17 = scalar_lea.vmem %s1072_s0, %s682_s14  ;;  %714 = vmatprep.subr.bf16.mxu1 %v713_v12  ;;  %v723_v20 = vpack.c.bf16 %v332_v19, %v326_v18  ;;  %v331_v22 = vld [vmem:[#allocation2 + $0x48] sm:$0xff]  ;;  %v683_v24 = vld [vmem:[%s1074_s2] ss:$0 sm:$0xff]  ;;  %v324_v25 = vld [vmem:[#allocation2 + $0x10] sm:$0xff]  ;;  %v342_v37 = vsub.s32 1, %v337_v33  ;;  %v358_v38 = vsub.s32 5, %v337_v33  ;;  %s1028_s13 = scalar_lea.hbm %s1077_s5, %s726_s30 }
  0x3a   : > { %v235_v8 = vld [vmem:[%s234_s17] sm:$0xff]  ;;  %716 = vmatpush1.bf16.msra.mxu1 %v715_v16  ;;  %v717_v23 = vpack.c.bf16 %v331_v22, %v325_v21  ;;  %s725_s8 = smul.u32 48, %s228_s26  ;;  %v346_v41 = vsub.s32 2, %v337_v33  ;;  %v350_v44 = vsub.s32 3, %v337_v33  ;;  %s591_s22 = scalar_lea.sflag [#allocation4], %s228_s26 }
  0x3b   : > { %712 = vmatpush3.bf16.msra.mxu0 %v711_v7  ;;  %v330_v26 = vld [vmem:[#allocation2 + $0x40] sm:$0xff]  ;;  %p1088_p9 = scmp.ne.s32.totalorder %s1081_s28, 0  ;;  %s884_s15 = smov [#allocation5]  }
  0x3c   : > { %722 = vmatprep.subr.bf16.mxu0 %v721_v17  ;;  %718 = vmatprep.subr.bf16.mxu1 %v717_v23  ;;  %v719_v30 = vpack.c.bf16 %v330_v26, %v324_v25  ;;  %v334_v36 = vld [vmem:[%s1076_s4] sm:$0x3f]  ;;  %s230_s9 = scalar_lea.vmem [#allocation5], %s725_s8  ;;  %s814_s16 = sshll.u32 %s884_s15, 4  ;;  %s815_s16 = int_to_ptr.vmem [resolvable:$false] %s814_s16 }
  0x3d   : > { %v339_v39 = vrot.slane %v334_v36, %v338_v34  ;;  %v355_v40 = vrot.slane %v334_v36, %v354_v35  ;;  %v343_v42 = vrot.slane %v334_v36, %v342_v37  ;;  %v359_v43 = vrot.slane %v334_v36, %v358_v38  ;;  %s605_s10 = sshll.u32 %s230_s9, 4  ;;  %s816_s17 = scalar_lea.vmem %s815_s16, 1536  ;;  %s1030_s10 = int_to_ptr.vmem [resolvable:$true] %s605_s10 }
  0x3e   : > { %705 = vmatmul.mubr.msk.f32.vlgmr.msra.gmra.mrb[0].mxu0 %vm247_vm1, %v235_v8  ;;  %v347_v51 = vrot.slane %v334_v36, %v346_v41  ;;  %v351_v54 = vrot.slane %v334_v36, %v350_v44  ;;  %s810_s14 = scalar_lea.vmem %s1030_s10, 768  ;;  %p817_p2 = scmp.lt.s32.totalorder %s1030_s10, %s815_s16 }
  0x3f   : > { %576 = vmatprep.mubr.f32.mxu0 %v883_v1  ;;  %724 = vmatpush1.bf16.msra.mxu0 %v723_v20  ;;  %p811_p6 = scmp.ne.s32.totalorder %s1030_s10, %s810_s14  ;;  %p818_p3 = scmp.lt.s32.totalorder %s816_s17, %s810_s14 }
  0x41   : > { %p812_p10 = pnand %p811_p6, %p1088_p9  ;;  %p819_p4 = por %p818_p3, %p817_p2 }
  0x43   : > { %p813_p12 = pneg %p812_p10 }
  0x45   : > { %p820_p7 = pnand %p819_p4, %p813_p12 }
 0x111   : > { %v317_v27 = vpop.f32.mrb[0].mxu0 }
 0x112   : > { %v318_v28 = vadd.f32 %v683_v24, %v317_v27  ;;  %v706_v29 = vpop.f32.mrb[1].mxu0 }
 0x114   : > { %v321_v31 = vmax.f32 %v318_v28, 0.0 }
 0x116   : > { %685 = vmatmul.mubr.msk.f32.vlgmr.msra.gmra.mrb[0].mxu1 %vm366_vm2, %v321_v31  ;;  %687 = vmatmul.mubr.msk.f32.vlgmr.msra.gmra.mrb[2].mxu0 %vm366_vm2, %v321_v31 }
 0x117   : > { %720 = vmatpush1.bf16.msra.mxu1 %v719_v30  ;;  %505 = vmatprep.mubr.f32.mxu1 %v883_v1 }
 0x11a   : > { %686 = vmatmul.mubr.msk.f32.vlgmr.msra.gmra.mrb[2].mxu1 %vm366_vm2, %v321_v31 }
 0x1e9   : > { %v436_v45 = vpop.f32.mrb[0].mxu1  ;;  %v578_v46 = vpop.f32.mrb[2].mxu0 }
 0x1ea   : > { %v437_v47 = vadd.f32 %v436_v45, %v339_v39  ;;  %v579_v48 = vadd.f32 %v578_v46, %v355_v40  ;;  %v438_v49 = vpop.f32.mrb[1].mxu1  ;;  %v580_v50 = vpop.f32.mrb[3].mxu0 }
 0x1eb   : > { %v439_v52 = vadd.f32 %v438_v49, %v343_v42  ;;  %v581_v53 = vadd.f32 %v580_v50, %v359_v43 }
 0x1ec   : > { %583 = vst [vmem:[%s230_s9] sm:$0xff] %v437_v47  ;;  %587 = vst [vmem:[%s230_s9 + $0x20] sm:$0xff] %v579_v48 }
 0x1ed   : > { %584 = vst [vmem:[%s230_s9 + $0x8] sm:$0xff] %v439_v52  ;;  %589 = vst.msk [vmem:[%s230_s9 + $0x28] sm:$0xff] %vm588_vm3, %v581_v53  ;;  %v507_v55 = vpop.f32.mrb[2].mxu1 }
 0x1ee   : > { %v508_v56 = vadd.f32 %v507_v55, %v347_v51  ;;  %v509_v57 = vpop.f32.mrb[3].mxu1 }
 0x1ef   : > { %v510_v58 = vadd.f32 %v509_v57, %v351_v54 }
 0x1f0   : > { %585 = vst [vmem:[%s230_s9 + $0x10] sm:$0xff] %v508_v56 }
 0x1f1   : > { %586 = vst [vmem:[%s230_s9 + $0x18] sm:$0xff] %v510_v58 }
 0x1f2   : > { %823 = shalt.err (!%p820_p7)
}
 0x1f3   : > { %s824_s23 = scalar_lea.hbm %s1028_s13, 768  ;;  %s828_s6 = scalar_lea.hbm %s1077_s5, 1536 }
 0x1f4   : > { %p825_p8 = scmp.ne.s32.totalorder %s1028_s13, %s824_s23  ;;  %p829_p1 = scmp.lt.u32.totalorder %s1028_s13, %s1077_s5 }
 0x1f5   : > { %p830_p0 = scmp.lt.u32.totalorder %s828_s6, %s824_s23  ;;  %p832_p6 = scmp.lt.u32.totalorder %s824_s23, %s1028_s13 }
 0x1f6   : > { %p826_p11 = pnand %p825_p8, %p1088_p9 }
 0x1f7   : > { %p831_p5 = por %p830_p0, %p829_p1 }
 0x1f8   : > { %p827_p13 = pneg %p826_p11 }
 0x1f9   : > { %p833_p10 = por %p832_p6, %p831_p5 }
 0x1fb   : > { %p834_p12 = pnand %p833_p10, %p827_p13 }
 0x1fd   : > { %837 = shalt.err (!%p834_p12)
}
 0x1fe   : > { %731 = dma.vmem_to_hbm [thread:$0]  (%p1088_p9), %s1030_s10, 768, %s1028_s13, %s591_s22  }
 0x1ff PF: > { %p743_p2 = scmp.ge.s32.totalorder %s876_s21, 2  ;;  %s617_s30 = sand.u32 1, %s864_s18  }
 0x200   : > { %p1089_p3 = scmp.ne.s32.totalorder %s1082_s29, 0  ;;  %s618_s9 = scalar_lea.sflag [#allocation4], %s617_s30 }
 0x202   : > { %p738_p4 = pnand %p743_p2, %p1089_p3 }
 0x204   : > { %859 = dma.done.wait (!%p738_p4), %s618_s9, 768  }
 0x205   : > { %861 = vsyncadd (!%p738_p4), %s618_s9, 4294966528  ;;  %p16_p7 = scmp.ge.s32.totalorder %s940_s24, 4   ;;  %s1090_s18 = smov %s868_s19 }
 0x206   : > { %s1091_s19 = smov %s872_s20  ;;  %s1092_s20 = smov %s951_s27 }
 0x207   : > { %s1093_s21 = smov %s940_s24  ;;  %18 = sbr.rel (!%p16_p7) target bundleno = 4 (0x4), region = 80 }
 0x20e   :  { %623 = vsyncpa [#allocation3], 1 }
 0x20f   :  { %625 = vsyncpa [#allocation3 + $0x1], 1 }
 0x210   :  { %626 = vsyncpa [#allocation4], 1 }
 0x211   :  { %628 = vsyncpa [#allocation4 + $0x1], 1 }

</bundles_post_ra>
